<compile_context>
chip_gen: v7x
topology: tpu7x:2x2x1
jax: 0.10.0
libtpu: 0.0.40
codegen_flags: <defaults>
</compile_context>

<pallas_src>
import functools
import math

import jax
import jax.numpy as jnp
from jax.experimental import pallas as pl
from jax.experimental.pallas import tpu as pltpu


def _round_up(x: int, m: int) -> int:
    return (x + m - 1) // m * m


def _mhca_kernel(q_ref, k_ref, v_ref, wq_ref, wk_ref, wv_ref, perm_ref, o_ref,
                 *, num_heads: int, depth: int):
    H, D = num_heads, depth
    hi = jax.lax.Precision.HIGHEST

    # Per-head projections as single wide matmuls -> (TILE_B, H*D),
    # head-major columns (head h occupies lanes [h*D, (h+1)*D)).
    qh = jnp.dot(q_ref[...], wq_ref[...],
                 preferred_element_type=jnp.float32, precision=hi)
    kh = jnp.dot(k_ref[...], wk_ref[...],
                 preferred_element_type=jnp.float32, precision=hi)
    vh = jnp.dot(v_ref[...], wv_ref[...],
                 preferred_element_type=jnp.float32, precision=hi)

    scale = jnp.float32(1.0 / math.sqrt(D))

    # Attention over the head axis (H x H scores per batch row) on the VPU,
    # with TILE_B in the sublane dimension.  Fully unrolled (H, D tiny).
    outs = []
    for h in range(H):
        q_h = qh[:, h * D:(h + 1) * D]                                    # (TB, D)
        s = jnp.concatenate(
            [jnp.sum(q_h * kh[:, g * D:(g + 1) * D], axis=-1, keepdims=True)
             for g in range(H)],
            axis=-1) * scale                                              # (TB, H)
        s = s - jnp.max(s, axis=-1, keepdims=True)                        # stable softmax
        e = jnp.exp(s)
        w = e / jnp.sum(e, axis=-1, keepdims=True)
        out_h = w[:, 0:1] * vh[:, 0:D]
        for g in range(1, H):
            out_h = out_h + w[:, g:g + 1] * vh[:, g * D:(g + 1) * D]
        outs.append(out_h)                                                # (TB, D)

    out_hm = jnp.concatenate(outs, axis=-1)                               # (TB, H*D)

    # Fused `transpose(1, 2).view(B, -1)`: head-major column (h*D + d) goes to
    # interleaved column (d*H + h) via one tiny exact permutation matmul
    # (MXU has plenty of slack in this HBM-bound kernel; HIGHEST keeps it exact).
    o_ref[...] = jnp.dot(out_hm, perm_ref[...],
                         preferred_element_type=jnp.float32,
                         precision=hi).astype(o_ref.dtype)


def multi_head_cross_attention(query, keys, values, wq, wk, wv, *,
                               max_tile_b: int = 512):
    """query: (B, Dq), keys: (B, Dk), values: (B, Dv).
    wq/wk/wv: (H, Din, D) stacked per-head weights (transposed nn.Linear.weight).
    Returns (B, H*D) == (B, query_dim), matching the PyTorch forward."""
    B, Dq = query.shape
    Dk = keys.shape[1]
    Dv = values.shape[1]
    H, _, D = wq.shape
    HD = H * D

    # ---- wrapper-side layout glue (no FLOPs) -------------------------------
    # Flatten per-head weights to (Din, H*D) so each projection is one matmul.
    wq2 = jnp.transpose(wq, (1, 0, 2)).reshape(Dq, HD)
    wk2 = jnp.transpose(wk, (1, 0, 2)).reshape(Dk, HD)
    wv2 = jnp.transpose(wv, (1, 0, 2)).reshape(Dv, HD)

    # Permutation matrix for the fused output transpose: perm[h*D+d, d*H+h] = 1.
    rows = jnp.arange(HD)
    perm = jax.nn.one_hot((rows % D) * H + rows // D, HD, dtype=jnp.float32)

    # ---- batch tiling -------------------------------------------------------
    # Multiple of 8 sublanes; large tiles for pipelining efficiency; >= 2 tiles
    # when the batch allows it (so megacore parts can split the work).
    tb = min(max_tile_b, max(8, _round_up(pl.cdiv(B, 2), 8)))
    Bp = _round_up(B, tb)
    if Bp != B:
        pad = ((0, Bp - B), (0, 0))
        query = jnp.pad(query, pad)
        keys = jnp.pad(keys, pad)
        values = jnp.pad(values, pad)

    kernel = functools.partial(_mhca_kernel, num_heads=H, depth=D)

    out = pl.pallas_call(
        kernel,
        out_shape=jax.ShapeDtypeStruct((Bp, HD), jnp.float32),
        grid_spec=pltpu.PrefetchScalarGridSpec(
            num_scalar_prefetch=0,
            grid=(Bp // tb,),
            in_specs=[
                pl.BlockSpec((tb, Dq), lambda i: (i, 0)),
                pl.BlockSpec((tb, Dk), lambda i: (i, 0)),
                pl.BlockSpec((tb, Dv), lambda i: (i, 0)),
                pl.BlockSpec((Dq, HD), lambda i: (0, 0)),   # weights: constant block,
                pl.BlockSpec((Dk, HD), lambda i: (0, 0)),   # fetched once across steps
                pl.BlockSpec((Dv, HD), lambda i: (0, 0)),
                pl.BlockSpec((HD, HD), lambda i: (0, 0)),   # output permutation
            ],
            out_specs=pl.BlockSpec((tb, HD), lambda i: (i, 0)),
        ),
        compiler_params=pltpu.CompilerParams(
            dimension_semantics=("parallel",)),
    )(query, keys, values, wq2, wk2, wv2, perm)

    return out[:B] if Bp != B else out


def reference(query, keys, values, wq, wk, wv):
    """Pure-JAX reference, mirrors the PyTorch forward exactly."""
    H, _, D = wq.shape
    hi = jax.lax.Precision.HIGHEST
    q = jnp.einsum("bq,hqd->bhd", query, wq, precision=hi)
    k = jnp.einsum("bk,hkd->bhd", keys, wk, precision=hi)
    v = jnp.einsum("bv,hvd->bhd", values, wv, precision=hi)
    s = jnp.einsum("bhd,bgd->bhg", q, k, precision=hi) / math.sqrt(D)
    w = jax.nn.softmax(s, axis=-1)
    out = jnp.einsum("bhg,bgd->bhd", w, v, precision=hi)
    return jnp.transpose(out, (0, 2, 1)).reshape(query.shape[0], -1)


if __name__ == "__main__":
    # Small shapes consistent with the module: query_dim divisible by num_heads.
    B, Dq, Dk, Dv, H = 8, 32, 24, 16, 4
    D = Dq // H

    key = jax.random.PRNGKey(0)
    kq, kk, kv, kwq, kwk, kwv = jax.random.split(key, 6)

    query = jax.random.normal(kq, (B, Dq), dtype=jnp.float32)
    keys = jax.random.normal(kk, (B, Dk), dtype=jnp.float32)
    values = jax.random.normal(kv, (B, Dv), dtype=jnp.float32)

    # Deterministic synthetic weights (stacked per-head, already transposed for x @ W).
    wq = jax.random.normal(kwq, (H, Dq, D), dtype=jnp.float32) / math.sqrt(Dq)
    wk = jax.random.normal(kwk, (H, Dk, D), dtype=jnp.float32) / math.sqrt(Dk)
    wv = jax.random.normal(kwv, (H, Dv, D), dtype=jnp.float32) / math.sqrt(Dv)

    out = jax.jit(multi_head_cross_attention)(query, keys, values, wq, wk, wv)
    out = jax.block_until_ready(out)

    ref = reference(query, keys, values, wq, wk, wv)
    assert out.shape == (B, Dq), f"bad output shape {out.shape}"
    assert jnp.allclose(out, ref, atol=1e-3, rtol=1e-3), "kernel/reference mismatch"

    print("KERNEL_OK")
</pallas_src>

<mosaic_0001>
module attributes {stable_mosaic.version = 11 : i64} {
  func.func @_mhca_kernel(%arg0: i32, %arg1: memref<8x32xf32, #tpu.memory_space<vmem>>, %arg2: memref<8x24xf32, #tpu.memory_space<vmem>>, %arg3: memref<8x16xf32, #tpu.memory_space<vmem>>, %arg4: memref<32x32xf32, #tpu.memory_space<vmem>>, %arg5: memref<24x32xf32, #tpu.memory_space<vmem>>, %arg6: memref<16x32xf32, #tpu.memory_space<vmem>>, %arg7: memref<32x32xf32, #tpu.memory_space<vmem>>, %arg8: memref<8x32xf32, #tpu.memory_space<vmem>>) attributes {dimension_semantics = [#tpu.dimension_semantics<parallel>], iteration_bounds = array<i64: 1>, scalar_prefetch = 0 : i64, scratch_operands = 0 : i64, tpu.core_type = #tpu.core_type<tc>, window_params = [{transform_indices = @transform_0, window_bounds = array<i64: 8, 32>}, {transform_indices = @transform_1, window_bounds = array<i64: 8, 24>}, {transform_indices = @transform_2, window_bounds = array<i64: 8, 16>}, {pipeline_mode = #tpu.pipeline_mode<synchronous>, transform_indices = @transform_3, window_bounds = array<i64: 32, 32>}, {pipeline_mode = #tpu.pipeline_mode<synchronous>, transform_indices = @transform_4, window_bounds = array<i64: 24, 32>}, {pipeline_mode = #tpu.pipeline_mode<synchronous>, transform_indices = @transform_5, window_bounds = array<i64: 16, 32>}, {pipeline_mode = #tpu.pipeline_mode<synchronous>, transform_indices = @transform_6, window_bounds = array<i64: 32, 32>}, {transform_indices = @transform_7, window_bounds = array<i64: 8, 32>}]} {
    %c0 = arith.constant 0 : index
    %c0_0 = arith.constant 0 : index
    %0 = vector.load %arg1[%c0, %c0_0] : memref<8x32xf32, #tpu.memory_space<vmem>>, vector<8x32xf32>
    %c0_1 = arith.constant 0 : index
    %c0_2 = arith.constant 0 : index
    %1 = vector.load %arg4[%c0_1, %c0_2] : memref<32x32xf32, #tpu.memory_space<vmem>>, vector<32x32xf32>
    %cst = arith.constant dense<0.000000e+00> : vector<8x32xf32>
    %2 = tpu.matmul %0, %1, %cst {dimension_numbers = #tpu.dot_dimension_numbers<[1], [0], [0], [1], [0, 0, 1, 1], [], []>, precision = #tpu.contract_precision<fp32>} : vector<8x32xf32>, vector<32x32xf32>, vector<8x32xf32> -> vector<8x32xf32>
    %c0_3 = arith.constant 0 : index
    %c0_4 = arith.constant 0 : index
    %3 = vector.load %arg2[%c0_3, %c0_4] : memref<8x24xf32, #tpu.memory_space<vmem>>, vector<8x24xf32>
    %c0_5 = arith.constant 0 : index
    %c0_6 = arith.constant 0 : index
    %4 = vector.load %arg5[%c0_5, %c0_6] : memref<24x32xf32, #tpu.memory_space<vmem>>, vector<24x32xf32>
    %cst_7 = arith.constant dense<0.000000e+00> : vector<8x32xf32>
    %5 = tpu.matmul %3, %4, %cst_7 {dimension_numbers = #tpu.dot_dimension_numbers<[1], [0], [0], [1], [0, 0, 1, 1], [], []>, precision = #tpu.contract_precision<fp32>} : vector<8x24xf32>, vector<24x32xf32>, vector<8x32xf32> -> vector<8x32xf32>
    %c0_8 = arith.constant 0 : index
    %c0_9 = arith.constant 0 : index
    %6 = vector.load %arg3[%c0_8, %c0_9] : memref<8x16xf32, #tpu.memory_space<vmem>>, vector<8x16xf32>
    %c0_10 = arith.constant 0 : index
    %c0_11 = arith.constant 0 : index
    %7 = vector.load %arg6[%c0_10, %c0_11] : memref<16x32xf32, #tpu.memory_space<vmem>>, vector<16x32xf32>
    %cst_12 = arith.constant dense<0.000000e+00> : vector<8x32xf32>
    %8 = tpu.matmul %6, %7, %cst_12 {dimension_numbers = #tpu.dot_dimension_numbers<[1], [0], [0], [1], [0, 0, 1, 1], [], []>, precision = #tpu.contract_precision<fp32>} : vector<8x16xf32>, vector<16x32xf32>, vector<8x32xf32> -> vector<8x32xf32>
    %9 = vector.extract_strided_slice %2 {offsets = [0, 0], sizes = [8, 8], strides = [1, 1]} : vector<8x32xf32> to vector<8x8xf32>
    %10 = vector.extract_strided_slice %5 {offsets = [0, 0], sizes = [8, 8], strides = [1, 1]} : vector<8x32xf32> to vector<8x8xf32>
    %11 = arith.mulf %9, %10 : vector<8x8xf32>
    %cst_13 = arith.constant dense<0.000000e+00> : vector<8xf32>
    %12 = vector.multi_reduction <add>, %11, %cst_13 [1] : vector<8x8xf32> to vector<8xf32>
    %13 = vector.shape_cast %12 : vector<8xf32> to vector<8x1xf32>
    %14 = vector.extract_strided_slice %5 {offsets = [0, 8], sizes = [8, 8], strides = [1, 1]} : vector<8x32xf32> to vector<8x8xf32>
    %15 = arith.mulf %9, %14 : vector<8x8xf32>
    %cst_14 = arith.constant dense<0.000000e+00> : vector<8xf32>
    %16 = vector.multi_reduction <add>, %15, %cst_14 [1] : vector<8x8xf32> to vector<8xf32>
    %17 = vector.shape_cast %16 : vector<8xf32> to vector<8x1xf32>
    %18 = vector.extract_strided_slice %5 {offsets = [0, 16], sizes = [8, 8], strides = [1, 1]} : vector<8x32xf32> to vector<8x8xf32>
    %19 = arith.mulf %9, %18 : vector<8x8xf32>
    %cst_15 = arith.constant dense<0.000000e+00> : vector<8xf32>
    %20 = vector.multi_reduction <add>, %19, %cst_15 [1] : vector<8x8xf32> to vector<8xf32>
    %21 = vector.shape_cast %20 : vector<8xf32> to vector<8x1xf32>
    %22 = vector.extract_strided_slice %5 {offsets = [0, 24], sizes = [8, 8], strides = [1, 1]} : vector<8x32xf32> to vector<8x8xf32>
    %23 = arith.mulf %9, %22 : vector<8x8xf32>
    %cst_16 = arith.constant dense<0.000000e+00> : vector<8xf32>
    %24 = vector.multi_reduction <add>, %23, %cst_16 [1] : vector<8x8xf32> to vector<8xf32>
    %25 = vector.shape_cast %24 : vector<8xf32> to vector<8x1xf32>
    %26 = tpu.concatenate %13, %17, %21, %25 in 1 : vector<8x1xf32>, vector<8x1xf32>, vector<8x1xf32>, vector<8x1xf32> -> vector<8x4xf32>
    %cst_17 = arith.constant 0.353553385 : f32
    %27 = vector.broadcast %cst_17 : f32 to vector<8x4xf32>
    %28 = arith.mulf %26, %27 : vector<8x4xf32>
    %cst_18 = arith.constant dense<0xFF800000> : vector<8xf32>
    %29 = vector.multi_reduction <maximumf>, %28, %cst_18 [1] : vector<8x4xf32> to vector<8xf32>
    %30 = vector.shape_cast %29 : vector<8xf32> to vector<8x1xf32>
    %31 = vector.broadcast %30 : vector<8x1xf32> to vector<8x4xf32>
    %32 = arith.subf %28, %31 : vector<8x4xf32>
    %33 = math.exp %32 : vector<8x4xf32>
    %cst_19 = arith.constant dense<0.000000e+00> : vector<8xf32>
    %34 = vector.multi_reduction <add>, %33, %cst_19 [1] : vector<8x4xf32> to vector<8xf32>
    %35 = vector.shape_cast %34 : vector<8xf32> to vector<8x1xf32>
    %36 = vector.broadcast %35 : vector<8x1xf32> to vector<8x4xf32>
    %37 = arith.divf %33, %36 : vector<8x4xf32>
    %38 = vector.extract_strided_slice %37 {offsets = [0, 0], sizes = [8, 1], strides = [1, 1]} : vector<8x4xf32> to vector<8x1xf32>
    %39 = vector.extract_strided_slice %8 {offsets = [0, 0], sizes = [8, 8], strides = [1, 1]} : vector<8x32xf32> to vector<8x8xf32>
    %40 = vector.broadcast %38 : vector<8x1xf32> to vector<8x8xf32>
    %41 = arith.mulf %40, %39 : vector<8x8xf32>
    %42 = vector.extract_strided_slice %37 {offsets = [0, 1], sizes = [8, 1], strides = [1, 1]} : vector<8x4xf32> to vector<8x1xf32>
    %43 = vector.extract_strided_slice %8 {offsets = [0, 8], sizes = [8, 8], strides = [1, 1]} : vector<8x32xf32> to vector<8x8xf32>
    %44 = vector.broadcast %42 : vector<8x1xf32> to vector<8x8xf32>
    %45 = arith.mulf %44, %43 : vector<8x8xf32>
    %46 = arith.addf %41, %45 : vector<8x8xf32>
    %47 = vector.extract_strided_slice %37 {offsets = [0, 2], sizes = [8, 1], strides = [1, 1]} : vector<8x4xf32> to vector<8x1xf32>
    %48 = vector.extract_strided_slice %8 {offsets = [0, 16], sizes = [8, 8], strides = [1, 1]} : vector<8x32xf32> to vector<8x8xf32>
    %49 = vector.broadcast %47 : vector<8x1xf32> to vector<8x8xf32>
    %50 = arith.mulf %49, %48 : vector<8x8xf32>
    %51 = arith.addf %46, %50 : vector<8x8xf32>
    %52 = vector.extract_strided_slice %37 {offsets = [0, 3], sizes = [8, 1], strides = [1, 1]} : vector<8x4xf32> to vector<8x1xf32>
    %53 = vector.extract_strided_slice %8 {offsets = [0, 24], sizes = [8, 8], strides = [1, 1]} : vector<8x32xf32> to vector<8x8xf32>
    %54 = vector.broadcast %52 : vector<8x1xf32> to vector<8x8xf32>
    %55 = arith.mulf %54, %53 : vector<8x8xf32>
    %56 = arith.addf %51, %55 : vector<8x8xf32>
    %57 = vector.extract_strided_slice %2 {offsets = [0, 8], sizes = [8, 8], strides = [1, 1]} : vector<8x32xf32> to vector<8x8xf32>
    %58 = vector.extract_strided_slice %5 {offsets = [0, 0], sizes = [8, 8], strides = [1, 1]} : vector<8x32xf32> to vector<8x8xf32>
    %59 = arith.mulf %57, %58 : vector<8x8xf32>
    %cst_20 = arith.constant dense<0.000000e+00> : vector<8xf32>
    %60 = vector.multi_reduction <add>, %59, %cst_20 [1] : vector<8x8xf32> to vector<8xf32>
    %61 = vector.shape_cast %60 : vector<8xf32> to vector<8x1xf32>
    %62 = vector.extract_strided_slice %5 {offsets = [0, 8], sizes = [8, 8], strides = [1, 1]} : vector<8x32xf32> to vector<8x8xf32>
    %63 = arith.mulf %57, %62 : vector<8x8xf32>
    %cst_21 = arith.constant dense<0.000000e+00> : vector<8xf32>
    %64 = vector.multi_reduction <add>, %63, %cst_21 [1] : vector<8x8xf32> to vector<8xf32>
    %65 = vector.shape_cast %64 : vector<8xf32> to vector<8x1xf32>
    %66 = vector.extract_strided_slice %5 {offsets = [0, 16], sizes = [8, 8], strides = [1, 1]} : vector<8x32xf32> to vector<8x8xf32>
    %67 = arith.mulf %57, %66 : vector<8x8xf32>
    %cst_22 = arith.constant dense<0.000000e+00> : vector<8xf32>
    %68 = vector.multi_reduction <add>, %67, %cst_22 [1] : vector<8x8xf32> to vector<8xf32>
    %69 = vector.shape_cast %68 : vector<8xf32> to vector<8x1xf32>
    %70 = vector.extract_strided_slice %5 {offsets = [0, 24], sizes = [8, 8], strides = [1, 1]} : vector<8x32xf32> to vector<8x8xf32>
    %71 = arith.mulf %57, %70 : vector<8x8xf32>
    %cst_23 = arith.constant dense<0.000000e+00> : vector<8xf32>
    %72 = vector.multi_reduction <add>, %71, %cst_23 [1] : vector<8x8xf32> to vector<8xf32>
    %73 = vector.shape_cast %72 : vector<8xf32> to vector<8x1xf32>
    %74 = tpu.concatenate %61, %65, %69, %73 in 1 : vector<8x1xf32>, vector<8x1xf32>, vector<8x1xf32>, vector<8x1xf32> -> vector<8x4xf32>
    %cst_24 = arith.constant 0.353553385 : f32
    %75 = vector.broadcast %cst_24 : f32 to vector<8x4xf32>
    %76 = arith.mulf %74, %75 : vector<8x4xf32>
    %cst_25 = arith.constant dense<0xFF800000> : vector<8xf32>
    %77 = vector.multi_reduction <maximumf>, %76, %cst_25 [1] : vector<8x4xf32> to vector<8xf32>
    %78 = vector.shape_cast %77 : vector<8xf32> to vector<8x1xf32>
    %79 = vector.broadcast %78 : vector<8x1xf32> to vector<8x4xf32>
    %80 = arith.subf %76, %79 : vector<8x4xf32>
    %81 = math.exp %80 : vector<8x4xf32>
    %cst_26 = arith.constant dense<0.000000e+00> : vector<8xf32>
    %82 = vector.multi_reduction <add>, %81, %cst_26 [1] : vector<8x4xf32> to vector<8xf32>
    %83 = vector.shape_cast %82 : vector<8xf32> to vector<8x1xf32>
    %84 = vector.broadcast %83 : vector<8x1xf32> to vector<8x4xf32>
    %85 = arith.divf %81, %84 : vector<8x4xf32>
    %86 = vector.extract_strided_slice %85 {offsets = [0, 0], sizes = [8, 1], strides = [1, 1]} : vector<8x4xf32> to vector<8x1xf32>
    %87 = vector.extract_strided_slice %8 {offsets = [0, 0], sizes = [8, 8], strides = [1, 1]} : vector<8x32xf32> to vector<8x8xf32>
    %88 = vector.broadcast %86 : vector<8x1xf32> to vector<8x8xf32>
    %89 = arith.mulf %88, %87 : vector<8x8xf32>
    %90 = vector.extract_strided_slice %85 {offsets = [0, 1], sizes = [8, 1], strides = [1, 1]} : vector<8x4xf32> to vector<8x1xf32>
    %91 = vector.extract_strided_slice %8 {offsets = [0, 8], sizes = [8, 8], strides = [1, 1]} : vector<8x32xf32> to vector<8x8xf32>
    %92 = vector.broadcast %90 : vector<8x1xf32> to vector<8x8xf32>
    %93 = arith.mulf %92, %91 : vector<8x8xf32>
    %94 = arith.addf %89, %93 : vector<8x8xf32>
    %95 = vector.extract_strided_slice %85 {offsets = [0, 2], sizes = [8, 1], strides = [1, 1]} : vector<8x4xf32> to vector<8x1xf32>
    %96 = vector.extract_strided_slice %8 {offsets = [0, 16], sizes = [8, 8], strides = [1, 1]} : vector<8x32xf32> to vector<8x8xf32>
    %97 = vector.broadcast %95 : vector<8x1xf32> to vector<8x8xf32>
    %98 = arith.mulf %97, %96 : vector<8x8xf32>
    %99 = arith.addf %94, %98 : vector<8x8xf32>
    %100 = vector.extract_strided_slice %85 {offsets = [0, 3], sizes = [8, 1], strides = [1, 1]} : vector<8x4xf32> to vector<8x1xf32>
    %101 = vector.extract_strided_slice %8 {offsets = [0, 24], sizes = [8, 8], strides = [1, 1]} : vector<8x32xf32> to vector<8x8xf32>
    %102 = vector.broadcast %100 : vector<8x1xf32> to vector<8x8xf32>
    %103 = arith.mulf %102, %101 : vector<8x8xf32>
    %104 = arith.addf %99, %103 : vector<8x8xf32>
    %105 = vector.extract_strided_slice %2 {offsets = [0, 16], sizes = [8, 8], strides = [1, 1]} : vector<8x32xf32> to vector<8x8xf32>
    %106 = vector.extract_strided_slice %5 {offsets = [0, 0], sizes = [8, 8], strides = [1, 1]} : vector<8x32xf32> to vector<8x8xf32>
    %107 = arith.mulf %105, %106 : vector<8x8xf32>
    %cst_27 = arith.constant dense<0.000000e+00> : vector<8xf32>
    %108 = vector.multi_reduction <add>, %107, %cst_27 [1] : vector<8x8xf32> to vector<8xf32>
    %109 = vector.shape_cast %108 : vector<8xf32> to vector<8x1xf32>
    %110 = vector.extract_strided_slice %5 {offsets = [0, 8], sizes = [8, 8], strides = [1, 1]} : vector<8x32xf32> to vector<8x8xf32>
    %111 = arith.mulf %105, %110 : vector<8x8xf32>
    %cst_28 = arith.constant dense<0.000000e+00> : vector<8xf32>
    %112 = vector.multi_reduction <add>, %111, %cst_28 [1] : vector<8x8xf32> to vector<8xf32>
    %113 = vector.shape_cast %112 : vector<8xf32> to vector<8x1xf32>
    %114 = vector.extract_strided_slice %5 {offsets = [0, 16], sizes = [8, 8], strides = [1, 1]} : vector<8x32xf32> to vector<8x8xf32>
    %115 = arith.mulf %105, %114 : vector<8x8xf32>
    %cst_29 = arith.constant dense<0.000000e+00> : vector<8xf32>
    %116 = vector.multi_reduction <add>, %115, %cst_29 [1] : vector<8x8xf32> to vector<8xf32>
    %117 = vector.shape_cast %116 : vector<8xf32> to vector<8x1xf32>
    %118 = vector.extract_strided_slice %5 {offsets = [0, 24], sizes = [8, 8], strides = [1, 1]} : vector<8x32xf32> to vector<8x8xf32>
    %119 = arith.mulf %105, %118 : vector<8x8xf32>
    %cst_30 = arith.constant dense<0.000000e+00> : vector<8xf32>
    %120 = vector.multi_reduction <add>, %119, %cst_30 [1] : vector<8x8xf32> to vector<8xf32>
    %121 = vector.shape_cast %120 : vector<8xf32> to vector<8x1xf32>
    %122 = tpu.concatenate %109, %113, %117, %121 in 1 : vector<8x1xf32>, vector<8x1xf32>, vector<8x1xf32>, vector<8x1xf32> -> vector<8x4xf32>
    %cst_31 = arith.constant 0.353553385 : f32
    %123 = vector.broadcast %cst_31 : f32 to vector<8x4xf32>
    %124 = arith.mulf %122, %123 : vector<8x4xf32>
    %cst_32 = arith.constant dense<0xFF800000> : vector<8xf32>
    %125 = vector.multi_reduction <maximumf>, %124, %cst_32 [1] : vector<8x4xf32> to vector<8xf32>
    %126 = vector.shape_cast %125 : vector<8xf32> to vector<8x1xf32>
    %127 = vector.broadcast %126 : vector<8x1xf32> to vector<8x4xf32>
    %128 = arith.subf %124, %127 : vector<8x4xf32>
    %129 = math.exp %128 : vector<8x4xf32>
    %cst_33 = arith.constant dense<0.000000e+00> : vector<8xf32>
    %130 = vector.multi_reduction <add>, %129, %cst_33 [1] : vector<8x4xf32> to vector<8xf32>
    %131 = vector.shape_cast %130 : vector<8xf32> to vector<8x1xf32>
    %132 = vector.broadcast %131 : vector<8x1xf32> to vector<8x4xf32>
    %133 = arith.divf %129, %132 : vector<8x4xf32>
    %134 = vector.extract_strided_slice %133 {offsets = [0, 0], sizes = [8, 1], strides = [1, 1]} : vector<8x4xf32> to vector<8x1xf32>
    %135 = vector.extract_strided_slice %8 {offsets = [0, 0], sizes = [8, 8], strides = [1, 1]} : vector<8x32xf32> to vector<8x8xf32>
    %136 = vector.broadcast %134 : vector<8x1xf32> to vector<8x8xf32>
    %137 = arith.mulf %136, %135 : vector<8x8xf32>
    %138 = vector.extract_strided_slice %133 {offsets = [0, 1], sizes = [8, 1], strides = [1, 1]} : vector<8x4xf32> to vector<8x1xf32>
    %139 = vector.extract_strided_slice %8 {offsets = [0, 8], sizes = [8, 8], strides = [1, 1]} : vector<8x32xf32> to vector<8x8xf32>
    %140 = vector.broadcast %138 : vector<8x1xf32> to vector<8x8xf32>
    %141 = arith.mulf %140, %139 : vector<8x8xf32>
    %142 = arith.addf %137, %141 : vector<8x8xf32>
    %143 = vector.extract_strided_slice %133 {offsets = [0, 2], sizes = [8, 1], strides = [1, 1]} : vector<8x4xf32> to vector<8x1xf32>
    %144 = vector.extract_strided_slice %8 {offsets = [0, 16], sizes = [8, 8], strides = [1, 1]} : vector<8x32xf32> to vector<8x8xf32>
    %145 = vector.broadcast %143 : vector<8x1xf32> to vector<8x8xf32>
    %146 = arith.mulf %145, %144 : vector<8x8xf32>
    %147 = arith.addf %142, %146 : vector<8x8xf32>
    %148 = vector.extract_strided_slice %133 {offsets = [0, 3], sizes = [8, 1], strides = [1, 1]} : vector<8x4xf32> to vector<8x1xf32>
    %149 = vector.extract_strided_slice %8 {offsets = [0, 24], sizes = [8, 8], strides = [1, 1]} : vector<8x32xf32> to vector<8x8xf32>
    %150 = vector.broadcast %148 : vector<8x1xf32> to vector<8x8xf32>
    %151 = arith.mulf %150, %149 : vector<8x8xf32>
    %152 = arith.addf %147, %151 : vector<8x8xf32>
    %153 = vector.extract_strided_slice %2 {offsets = [0, 24], sizes = [8, 8], strides = [1, 1]} : vector<8x32xf32> to vector<8x8xf32>
    %154 = vector.extract_strided_slice %5 {offsets = [0, 0], sizes = [8, 8], strides = [1, 1]} : vector<8x32xf32> to vector<8x8xf32>
    %155 = arith.mulf %153, %154 : vector<8x8xf32>
    %cst_34 = arith.constant dense<0.000000e+00> : vector<8xf32>
    %156 = vector.multi_reduction <add>, %155, %cst_34 [1] : vector<8x8xf32> to vector<8xf32>
    %157 = vector.shape_cast %156 : vector<8xf32> to vector<8x1xf32>
    %158 = vector.extract_strided_slice %5 {offsets = [0, 8], sizes = [8, 8], strides = [1, 1]} : vector<8x32xf32> to vector<8x8xf32>
    %159 = arith.mulf %153, %158 : vector<8x8xf32>
    %cst_35 = arith.constant dense<0.000000e+00> : vector<8xf32>
    %160 = vector.multi_reduction <add>, %159, %cst_35 [1] : vector<8x8xf32> to vector<8xf32>
    %161 = vector.shape_cast %160 : vector<8xf32> to vector<8x1xf32>
    %162 = vector.extract_strided_slice %5 {offsets = [0, 16], sizes = [8, 8], strides = [1, 1]} : vector<8x32xf32> to vector<8x8xf32>
    %163 = arith.mulf %153, %162 : vector<8x8xf32>
    %cst_36 = arith.constant dense<0.000000e+00> : vector<8xf32>
    %164 = vector.multi_reduction <add>, %163, %cst_36 [1] : vector<8x8xf32> to vector<8xf32>
    %165 = vector.shape_cast %164 : vector<8xf32> to vector<8x1xf32>
    %166 = vector.extract_strided_slice %5 {offsets = [0, 24], sizes = [8, 8], strides = [1, 1]} : vector<8x32xf32> to vector<8x8xf32>
    %167 = arith.mulf %153, %166 : vector<8x8xf32>
    %cst_37 = arith.constant dense<0.000000e+00> : vector<8xf32>
    %168 = vector.multi_reduction <add>, %167, %cst_37 [1] : vector<8x8xf32> to vector<8xf32>
    %169 = vector.shape_cast %168 : vector<8xf32> to vector<8x1xf32>
    %170 = tpu.concatenate %157, %161, %165, %169 in 1 : vector<8x1xf32>, vector<8x1xf32>, vector<8x1xf32>, vector<8x1xf32> -> vector<8x4xf32>
    %cst_38 = arith.constant 0.353553385 : f32
    %171 = vector.broadcast %cst_38 : f32 to vector<8x4xf32>
    %172 = arith.mulf %170, %171 : vector<8x4xf32>
    %cst_39 = arith.constant dense<0xFF800000> : vector<8xf32>
    %173 = vector.multi_reduction <maximumf>, %172, %cst_39 [1] : vector<8x4xf32> to vector<8xf32>
    %174 = vector.shape_cast %173 : vector<8xf32> to vector<8x1xf32>
    %175 = vector.broadcast %174 : vector<8x1xf32> to vector<8x4xf32>
    %176 = arith.subf %172, %175 : vector<8x4xf32>
    %177 = math.exp %176 : vector<8x4xf32>
    %cst_40 = arith.constant dense<0.000000e+00> : vector<8xf32>
    %178 = vector.multi_reduction <add>, %177, %cst_40 [1] : vector<8x4xf32> to vector<8xf32>
    %179 = vector.shape_cast %178 : vector<8xf32> to vector<8x1xf32>
    %180 = vector.broadcast %179 : vector<8x1xf32> to vector<8x4xf32>
    %181 = arith.divf %177, %180 : vector<8x4xf32>
    %182 = vector.extract_strided_slice %181 {offsets = [0, 0], sizes = [8, 1], strides = [1, 1]} : vector<8x4xf32> to vector<8x1xf32>
    %183 = vector.extract_strided_slice %8 {offsets = [0, 0], sizes = [8, 8], strides = [1, 1]} : vector<8x32xf32> to vector<8x8xf32>
    %184 = vector.broadcast %182 : vector<8x1xf32> to vector<8x8xf32>
    %185 = arith.mulf %184, %183 : vector<8x8xf32>
    %186 = vector.extract_strided_slice %181 {offsets = [0, 1], sizes = [8, 1], strides = [1, 1]} : vector<8x4xf32> to vector<8x1xf32>
    %187 = vector.extract_strided_slice %8 {offsets = [0, 8], sizes = [8, 8], strides = [1, 1]} : vector<8x32xf32> to vector<8x8xf32>
    %188 = vector.broadcast %186 : vector<8x1xf32> to vector<8x8xf32>
    %189 = arith.mulf %188, %187 : vector<8x8xf32>
    %190 = arith.addf %185, %189 : vector<8x8xf32>
    %191 = vector.extract_strided_slice %181 {offsets = [0, 2], sizes = [8, 1], strides = [1, 1]} : vector<8x4xf32> to vector<8x1xf32>
    %192 = vector.extract_strided_slice %8 {offsets = [0, 16], sizes = [8, 8], strides = [1, 1]} : vector<8x32xf32> to vector<8x8xf32>
    %193 = vector.broadcast %191 : vector<8x1xf32> to vector<8x8xf32>
    %194 = arith.mulf %193, %192 : vector<8x8xf32>
    %195 = arith.addf %190, %194 : vector<8x8xf32>
    %196 = vector.extract_strided_slice %181 {offsets = [0, 3], sizes = [8, 1], strides = [1, 1]} : vector<8x4xf32> to vector<8x1xf32>
    %197 = vector.extract_strided_slice %8 {offsets = [0, 24], sizes = [8, 8], strides = [1, 1]} : vector<8x32xf32> to vector<8x8xf32>
    %198 = vector.broadcast %196 : vector<8x1xf32> to vector<8x8xf32>
    %199 = arith.mulf %198, %197 : vector<8x8xf32>
    %200 = arith.addf %195, %199 : vector<8x8xf32>
    %201 = tpu.concatenate %56, %104, %152, %200 in 1 : vector<8x8xf32>, vector<8x8xf32>, vector<8x8xf32>, vector<8x8xf32> -> vector<8x32xf32>
    %c0_41 = arith.constant 0 : index
    %c0_42 = arith.constant 0 : index
    %202 = vector.load %arg7[%c0_41, %c0_42] : memref<32x32xf32, #tpu.memory_space<vmem>>, vector<32x32xf32>
    %cst_43 = arith.constant dense<0.000000e+00> : vector<8x32xf32>
    %203 = tpu.matmul %201, %202, %cst_43 {dimension_numbers = #tpu.dot_dimension_numbers<[1], [0], [0], [1], [0, 0, 1, 1], [], []>, precision = #tpu.contract_precision<fp32>} : vector<8x32xf32>, vector<32x32xf32>, vector<8x32xf32> -> vector<8x32xf32>
    %c0_44 = arith.constant 0 : index
    %c0_45 = arith.constant 0 : index
    %204 = vector.load %arg8[%c0_44, %c0_45] : memref<8x32xf32, #tpu.memory_space<vmem>>, vector<8x32xf32>
    tpu.vector_store %arg8[%c0_44, %c0_45], %203 {strides = array<i32>} : memref<8x32xf32, #tpu.memory_space<vmem>>, vector<8x32xf32>,
    return
  }
  func.func @transform_0(%arg0: i32) -> (i32, i32) {
    %c0_i32 = arith.constant 0 : i32
    %c0_i32_0 = arith.constant 0 : i32
    return %arg0, %c0_i32 : i32, i32
  }
  func.func @transform_1(%arg0: i32) -> (i32, i32) {
    %c0_i32 = arith.constant 0 : i32
    %c0_i32_0 = arith.constant 0 : i32
    return %arg0, %c0_i32 : i32, i32
  }
  func.func @transform_2(%arg0: i32) -> (i32, i32) {
    %c0_i32 = arith.constant 0 : i32
    %c0_i32_0 = arith.constant 0 : i32
    return %arg0, %c0_i32 : i32, i32
  }
  func.func @transform_3(%arg0: i32) -> (i32, i32) {
    %c0_i32 = arith.constant 0 : i32
    %c0_i32_0 = arith.constant 0 : i32
    %c0_i32_1 = arith.constant 0 : i32
    return %c0_i32, %c0_i32_0 : i32, i32
  }
  func.func @transform_4(%arg0: i32) -> (i32, i32) {
    %c0_i32 = arith.constant 0 : i32
    %c0_i32_0 = arith.constant 0 : i32
    %c0_i32_1 = arith.constant 0 : i32
    return %c0_i32, %c0_i32_0 : i32, i32
  }
  func.func @transform_5(%arg0: i32) -> (i32, i32) {
    %c0_i32 = arith.constant 0 : i32
    %c0_i32_0 = arith.constant 0 : i32
    %c0_i32_1 = arith.constant 0 : i32
    return %c0_i32, %c0_i32_0 : i32, i32
  }
  func.func @transform_6(%arg0: i32) -> (i32, i32) {
    %c0_i32 = arith.constant 0 : i32
    %c0_i32_0 = arith.constant 0 : i32
    %c0_i32_1 = arith.constant 0 : i32
    return %c0_i32, %c0_i32_0 : i32, i32
  }
  func.func @transform_7(%arg0: i32) -> (i32, i32) {
    %c0_i32 = arith.constant 0 : i32
    %c0_i32_0 = arith.constant 0 : i32
    return %arg0, %c0_i32 : i32, i32
  }
}

</mosaic_0001>

<bundles_post_ra>
// kernel: multi_head_cross_attention.1
= control target key start
LH: loop header
LB: loop body
LE: loop exit
PB: predicated region body
PF: predicated region fallthrough
CT: control target
= control target key end

     0   :  { %v2858_v3 = vmov 0.0|0.0   ;;  %vm32_vm0 = vcmask 261120   ;;  %vm2859_vm1 = vmmov 0   ;;  %v2860_v10 = vmov 0.0   ;;  %s3275_s0 = inlined_call_operand.vmem [shape: f32[8,32], index: 0, kind: input, shape index: {}]   ;;  %s3276_s1 = inlined_call_operand.vmem [shape: f32[8,24], index: 1, kind: input, shape index: {}]   ;;  %s3277_s2 = inlined_call_operand.vmem [shape: f32[8,16], index: 2, kind: input, shape index: {}]   ;;  %s3278_s3 = inlined_call_operand.vmem [shape: f32[32,32], index: 3, kind: input, shape index: {}]   ;;  %s3279_s4 = inlined_call_operand.vmem [shape: f32[24,32], index: 4, kind: input, shape index: {}]   ;;  %s3280_s5 = inlined_call_operand.vmem [shape: f32[16,32], index: 5, kind: input, shape index: {}]   ;;  %s3281_s6 = inlined_call_operand.vmem [shape: f32[32,32], index: 6, kind: input, shape index: {}]   ;;  %s3282_s7 = inlined_call_operand.hbm [shape: f32[8,32], index: 7, kind: output, shape index: {}]  }
   0x1   :  { %v28_v0 = vld [vmem:[%s3278_s3] sm:$0xff]  ;;  %v29_v1 = vld [vmem:[%s3278_s3 + $0x8] sm:$0xff]  ;;  %v30_v2 = vld [vmem:[%s3278_s3 + $0x10] sm:$0xff]  ;;  %2644 = vmatprep.subr.bf16.mxu1 %v2858_v3  ;;  %2656 = vmatprep.subr.bf16.mxu0 %v2858_v3 }
   0x2   :  { %v37_v4 = vand.u32 4294901760, %v28_v0  ;;  %v40_v5 = vand.u32 4294901760, %v29_v1  ;;  %v31_v6 = vld [vmem:[%s3278_s3 + $0x18] sm:$0xff]  ;;  %v43_v7 = vand.u32 4294901760, %v30_v2  ;;  %v27_v8 = vld [vmem:[%s3275_s0] sm:$0xff]  ;;  %2424 = vmatprep.mubr.msk.f32.mxu1 %vm2859_vm1, %v2860_v10  ;;  %2446 = vmatprep.mubr.msk.f32.mxu0 %vm2859_vm1, %v2860_v10  ;;  %v523_v17 = vld [vmem:[%s3279_s4 + $0x8] sm:$0xff] }
   0x3   :  { %v46_v9 = vand.u32 4294901760, %v31_v6  ;;  %v34_v11 = vsel %vm32_vm0, %v27_v8, 0  ;;  %v2937_v12 = vld [vmem:[%s3279_s4] sm:$0xff] }
   0x4   :  { %v2939_v13 = vpack.c.bf16 %v40_v5, %v37_v4  ;;  %v2941_v14 = vsub.f32 %v28_v0, %v37_v4  ;;  %v2943_v15 = vsub.f32 %v29_v1, %v40_v5  ;;  %v2945_v16 = vsub.f32 %v30_v2, %v43_v7 }
   0x5   :  { %12 = vsyncpa [#allocation3], 0  ;;  %v2950_v18 = vpack.c.bf16 %v46_v9, %v43_v7  ;;  %v2952_v19 = vsub.f32 %v31_v6, %v46_v9  ;;  %v2954_v20 = vand.u32 4294901760, %v34_v11  ;;  %v530_v21 = vand.u32 4294901760, %v2937_v12  ;;  %v521_v33 = vld [vmem:[%s3276_s1] sm:$0xff]  ;;  %v524_v41 = vld [vmem:[%s3279_s4 + $0x10] sm:$0xff] }
   0x6   :  { %2646 = vmatpush3.bf16.msra.mxu1 %v2939_v13  ;;  %v118_v22 = vand.u32 4294901760, %v2941_v14  ;;  %v125_v23 = vand.u32 4294901760, %v2943_v15  ;;  %v2657_v24 = vpack.c.bf16 %v2943_v15, %v2941_v14  ;;  %v132_v25 = vand.u32 4294901760, %v2945_v16  ;;  %s2861_s1 = smov 16   ;;  %s2862_s4 = smov 8  }
   0x7   :  { %2647 = vmatprep.subr.bf16.mxu1 %v2858_v3  ;;  %v106_v26 = vsub.f32 %v34_v11, %v2954_v20  ;;  %v139_v27 = vand.u32 4294901760, %v2952_v19  ;;  %v533_v28 = vand.u32 4294901760, %v523_v17  ;;  %vm525_vm2 = vcmask 195584   ;;  %s2863_s17 = smov 112   ;;  %s2864_s18 = smov 120  }
   0x8   :  { %2658 = vmatpush3.bf16.msra.mxu0 %v2657_v24  ;;  %v2660_v29 = vpack.c.bf16 %v2952_v19, %v2945_v16  ;;  %v119_v30 = vsub.f32 %v2941_v14, %v118_v22  ;;  %v126_v31 = vsub.f32 %v2943_v15, %v125_v23  ;;  %v133_v32 = vsub.f32 %v2945_v16, %v132_v25  ;;  %s2865_s19 = smov 24   ;;  %s2866_s20 = smov 104  }
   0x9   :  { %2659 = vmatprep.subr.bf16.mxu0 %v2858_v3  ;;  %v107_v34 = vand.u32 4294901760, %v106_v26  ;;  %v140_v35 = vsub.f32 %v2952_v19, %v139_v27  ;;  %v2978_v38 = vsub.f32 %v2937_v12, %v530_v21  ;;  %v2980_v39 = vsub.f32 %v523_v17, %v533_v28 }
   0xa   :  { %2649 = vmatpush3.bf16.msra.mxu1 %v2950_v18  ;;  %v120_v36 = vand.u32 4294901760, %v119_v30  ;;  %v127_v37 = vand.u32 4294901760, %v126_v31  ;;  %v527_v42 = vsel %vm525_vm2, %v521_v33, 0  ;;  %v134_v44 = vand.u32 4294901760, %v133_v32 }
   0xb   :  { %v108_v40 = vsub.f32 %v106_v26, %v107_v34  ;;  %2650 = vmatprep.subr.bf16.mxu1 %v2858_v3  ;;  %v141_v45 = vand.u32 4294901760, %v140_v35  ;;  %v2987_v46 = vand.u32 4294901760, %v527_v42  ;;  %v2990_v48 = vand.u32 4294901760, %v524_v41 }
   0xc   :  { %2661 = vmatpush3.bf16.msra.mxu0 %v2660_v29  ;;  %v2651_v43 = vpack.c.bf16 %v127_v37, %v120_v36  ;;  %v610_v50 = vand.u32 4294901760, %v2978_v38  ;;  %v617_v51 = vand.u32 4294901760, %v2980_v39  ;;  %v2681_v57 = vpack.c.bf16 %v533_v28, %v530_v21 }
   0xd   :  { %v109_v47 = vand.u32 4294901760, %v108_v40  ;;  %2662 = vmatprep.subr.bf16.mxu0 %v2858_v3  ;;  %v2993_v49 = vsub.f32 %v527_v42, %v2987_v46  ;;  %v2654_v52 = vpack.c.bf16 %v141_v45, %v134_v44  ;;  %v623_v54 = vsub.f32 %v524_v41, %v2990_v48 }
   0xe   :  { %v611_v55 = vsub.f32 %v2978_v38, %v610_v50  ;;  %v618_v56 = vsub.f32 %v2980_v39, %v617_v51  ;;  %v2669_v58 = vpack.c.bf16 %v125_v23, %v118_v22  ;;  %v2672_v63 = vpack.c.bf16 %v139_v27, %v132_v25 }
   0xf   :  { %2425 = vmatmul.mubr.f32.vlgmr.msra.gmra.mrb[0].mxu1 %v109_v47  ;;  %2447 = vmatmul.mubr.f32.vlgmr.msra.gmra.mrb[0].mxu0 %v106_v26  ;;  %v599_v53 = vand.u32 4294901760, %v2993_v49  ;;  %v624_v62 = vand.u32 4294901760, %v623_v54  ;;  %v2687_v5 = vpack.c.bf16 %v2980_v39, %v2978_v38  ;;  %v2693_v6 = vpack.c.bf16 %v617_v51, %v610_v50 }
  0x10   :  { %2652 = vmatpush3.bf16.msra.mxu1 %v2651_v43  ;;  %2664 = vmatpush3.bf16.msra.mxu0 %v2939_v13  ;;  %v612_v60 = vand.u32 4294901760, %v611_v55  ;;  %v619_v61 = vand.u32 4294901760, %v618_v56  ;;  %vm1468_vm3 = vcmask 64512   ;;  %vm1494_vm4 = vcmask 7168  }
  0x11   :  { %2653 = vmatprep.subr.bf16.mxu1 %v2858_v3  ;;  %2665 = vmatprep.subr.bf16.mxu0 %v2858_v3  ;;  %v600_v59 = vsub.f32 %v2993_v49, %v599_v53  ;;  %v625_v2 = vsub.f32 %v623_v54, %v624_v62  ;;  %vm1496_vm5 = vcmask 15360   ;;  %vm1498_vm6 = vcmask 23552  }
  0x12   :  { %2435 = vmatprep.mubr.msk.f32.mxu1 %vm2859_vm1, %v2860_v10  ;;  %2457 = vmatprep.mubr.msk.f32.mxu0 %vm2859_vm1, %v2860_v10  ;;  %v2684_v1 = vpack.c.bf16 %v619_v61, %v612_v60  ;;  %vm1501_vm7 = vcmask 31744   ;;  %vm1004_vm8 = vcmask 130048  }
  0x13   :  { %v601_v0 = vand.u32 4294901760, %v600_v59  ;;  %v626_v4 = vand.u32 4294901760, %v625_v2 }
  0x14   :  { %2655 = vmatpush3.bf16.msra.mxu1 %v2654_v52  ;;  %2667 = vmatpush3.bf16.msra.mxu0 %v2950_v18 }
  0x15   :  { %2680 = vmatprep.subr.bf16.mxu1 %v2858_v3  ;;  %2668 = vmatprep.subr.bf16.mxu0 %v2858_v3 }
  0x17   :  { %2436 = vmatmul.mubr.f32.vlgmr.msra.gmra.mrb[0].mxu1 %v2954_v20  ;;  %2458 = vmatmul.mubr.f32.vlgmr.msra.gmra.mrb[0].mxu0 %v107_v34 }
  0x18   :  { %2682 = vmatpush3.bf16.msra.mxu1 %v2681_v57  ;;  %2670 = vmatpush3.bf16.msra.mxu0 %v2669_v58 }
  0x19   :  { %2486 = vmatprep.subr.mxu1 %v2860_v10  ;;  %2488 = vmatprep.mubr.msk.f32.mxu1 %vm2859_vm1, %v2860_v10 }
  0x1a   :  { %2671 = vmatprep.subr.bf16.mxu0 %v2858_v3  ;;  %2468 = vmatprep.mubr.msk.f32.mxu0 %vm2859_vm1, %v2860_v10 }
  0x1c   :  { %2487 = vmatpush3.msra.mxu1 %v2990_v48  ;;  %2673 = vmatpush3.bf16.msra.mxu0 %v2672_v63 }
  0x1d   :  { %2489 = vmatmul.mubr.f32.vlgmr.msra.gmra.mrb[2].mxu1 %v601_v0  ;;  %2683 = vmatprep.subr.bf16.mxu1 %v2858_v3 }
  0x1e   :  { %2685 = vmatpush3.bf16.msra.mxu1 %v2684_v1  ;;  %2674 = vmatprep.subr.bf16.mxu0 %v2858_v3 }
  0x1f   :  { %2469 = vmatmul.mubr.f32.vlgmr.msra.gmra.mrb[0].mxu0 %v2954_v20  ;;  %2495 = vmatprep.subr.mxu1 %v2860_v10 }
  0x20   :  { %2676 = vmatpush3.bf16.msra.mxu0 %v2939_v13  ;;  %2497 = vmatprep.mubr.msk.f32.mxu1 %vm2859_vm1, %v2860_v10 }
  0x21   :  { %2677 = vmatprep.subr.bf16.mxu0 %v2858_v3  ;;  %2479 = vmatprep.mubr.msk.f32.mxu0 %vm2859_vm1, %v2860_v10 }
  0x22   :  { %2496 = vmatpush3.msra.mxu1 %v626_v4 }
  0x23   :  { %2686 = vmatprep.subr.bf16.mxu1 %v2858_v3 }
  0x24   :  { %2679 = vmatpush3.bf16.msra.mxu0 %v2950_v18 }
  0x25   :  { %2498 = vmatmul.mubr.f32.vlgmr.msra.gmra.mrb[2].mxu1 %v2987_v46  ;;  %2716 = vmatprep.subr.bf16.mxu0 %v2858_v3 }
  0x26   :  { %2688 = vmatpush3.bf16.msra.mxu1 %v2687_v5  ;;  %2506 = vmatprep.mubr.msk.f32.mxu1 %vm2859_vm1, %v2860_v10 }
  0x27   :  { %2480 = vmatmul.mubr.f32.vlgmr.msra.gmra.mrb[0].mxu0 %v2954_v20  ;;  %2504 = vmatprep.subr.mxu1 %v2860_v10 }
  0x28   :  { %2586 = vmatprep.mubr.msk.f32.mxu0 %vm2859_vm1, %v2860_v10 }
  0x2a   :  { %2505 = vmatpush3.msra.mxu1 %v623_v54 }
  0x2b   :  { %2689 = vmatprep.subr.bf16.mxu1 %v2858_v3 }
  0x2d   :  { %2507 = vmatmul.mubr.f32.vlgmr.msra.gmra.mrb[2].mxu1 %v2993_v49 }
  0x2e   :  { %2691 = vmatpush3.bf16.msra.mxu1 %v2681_v57  ;;  %2515 = vmatprep.mubr.msk.f32.mxu1 %vm2859_vm1, %v2860_v10 }
  0x2f   :  { %2513 = vmatprep.subr.mxu1 %v2860_v10 }
  0x32   :  { %2514 = vmatpush3.msra.mxu1 %v2990_v48 }
  0x33   :  { %2692 = vmatprep.subr.bf16.mxu1 %v2858_v3 }
  0x35   :  { %2516 = vmatmul.mubr.f32.vlgmr.msra.gmra.mrb[2].mxu1 %v599_v53 }
  0x36   :  { %2694 = vmatpush3.bf16.msra.mxu1 %v2693_v6  ;;  %2524 = vmatprep.mubr.msk.f32.mxu1 %vm2859_vm1, %v2860_v10 }
  0x37   :  { %2522 = vmatprep.subr.mxu1 %v2860_v10 }
  0x3a   :  { %2523 = vmatpush3.msra.mxu1 %v624_v62 }
  0x3b   :  { %2695 = vmatprep.subr.bf16.mxu1 %v2858_v3 }
  0x3d   :  { %2525 = vmatmul.mubr.f32.vlgmr.msra.gmra.mrb[2].mxu1 %v2987_v46 }
  0x3e   :  { %2697 = vmatpush3.bf16.msra.mxu1 %v2681_v57  ;;  %2533 = vmatprep.mubr.msk.f32.mxu1 %vm2859_vm1, %v2860_v10 }
  0x3f   :  { %2531 = vmatprep.subr.mxu1 %v2860_v10 }
  0x42   :  { %2532 = vmatpush3.msra.mxu1 %v2990_v48 }
  0x43   :  { %2698 = vmatprep.subr.bf16.mxu1 %v2858_v3 }
  0x45   :  { %2534 = vmatmul.mubr.f32.vlgmr.msra.gmra.mrb[2].mxu1 %v2987_v46 }
  0x46   :  { %2540 = vmatprep.mubr.msk.f32.mxu1 %vm2859_vm1, %v2860_v10 }
  0xea   :  { %v202_v7 = vpop.f32.mrb[0].mxu1 }
  0xeb   :  { %v2437_v8 = vpop.f32.mrb[1].mxu1 }
  0xfa   :  { %v517_v9 = vpop.f32.mrb[0].mxu0 }
  0xfb   :  { %v3070_v11 = vadd.f32 %v517_v9, %v202_v7  ;;  %v2481_v12 = vpop.f32.mrb[1].mxu0 }
 0x118   :  { %v997_v13 = vpop.f32.mrb[2].mxu1 }
 0x119   :  { %1632 = vrot.lane.b32.xlu1 %v997_v13, %s2861_s1  ;;  %1549 = vrot.lane.b32.xlu0 %v997_v13, %s2862_s4  ;;  %v2535_v14 = vpop.f32.mrb[3].mxu1  ;;  %v1467_v15 = vmul.f32 %v3070_v11, %v997_v13 }
 0x11b   :  { %v1469_v48 = vsel %vm1468_vm3, %v1467_v15, 0.0 }
 0x11d   :  { %1480 = vrot.lane.b32.xlu1 %v997_v13, %s2863_s17  ;;  %1473 = vrot.lane.b32.xlu0 %v997_v13, %s2864_s18 }
 0x121   :  { %1712 = vrot.lane.b32.xlu0 %v997_v13, %s2865_s19  ;;  %1649 = vrot.lane.b32.xlu1 %v1467_v15, %s2863_s17 }
 0x125   :  { %1561 = vrot.lane.b32.xlu0 %v1467_v15, %s2864_s18 }
 0x18b   :  { %v1633_v16 = vpop.permute.xlu1 %1632  ;;  %v1550_v17 = vpop.permute.xlu0 %1549 }
 0x18c   :  { %v1635_v18 = vmul.f32 %v3070_v11, %v1633_v16  ;;  %v1552_v19 = vmul.f32 %v3070_v11, %v1550_v17 }
 0x18e   :  { %1554 = vrot.lane.b32.xlu1 %v1552_v19, %s2864_s18  ;;  %1637 = vrot.lane.b32.xlu0 %v1635_v18, %s2863_s17 }
 0x18f   :  { %v1481_v20 = vpop.permute.xlu1 %1480  ;;  %v1474_v21 = vpop.permute.xlu0 %1473 }
 0x190   :  { %v1483_v22 = vmul.f32 %v3070_v11, %v1481_v20  ;;  %v1476_v23 = vmul.f32 %v3070_v11, %v1474_v21 }
 0x192   :  { %1568 = vrot.lane.b32.xlu1 %v1476_v23, %s2864_s18  ;;  %1575 = vrot.lane.b32.xlu0 %v1483_v22, %s2864_s18  ;;  %v1484_v51 = vsel %vm1468_vm3, %v1483_v22, 0.0  ;;  %v1477_v54 = vsel %vm1468_vm3, %v1476_v23, 0.0 }
 0x193   :  { %v1713_v24 = vpop.permute.xlu0 %1712  ;;  %v1650_v28 = vpop.permute.xlu1 %1649 }
 0x194   :  { %v1715_v25 = vmul.f32 %v3070_v11, %v1713_v24  ;;  %v1652_v29 = vsel %vm1468_vm3, %v1650_v28, 0.0 }
 0x196   :  { %1643 = vrot.lane.b32.xlu1 %v1552_v19, %s2863_s17  ;;  %1717 = vrot.lane.b32.xlu0 %v1715_v25, %s2866_s20 }
 0x197   :  { %v1562_v26 = vpop.permute.xlu0 %1561 }
 0x198   :  { %v1564_v27 = vsel %vm1468_vm3, %v1562_v26, 0.0 }
 0x19a   :  { %1723 = vrot.lane.b32.xlu1 %v1635_v18, %s2866_s20  ;;  %1655 = vrot.lane.b32.xlu0 %v1476_v23, %s2863_s17 }
 0x19e   :  { %1729 = vrot.lane.b32.xlu1 %v1552_v19, %s2866_s20  ;;  %1735 = vrot.lane.b32.xlu0 %v1467_v15, %s2866_s20 }
 0x1a2   :  { %1487 = vrot.lane.b32.xlu1 %v997_v13, %s2866_s20 }
 0x1c6   :  { %1565 = vadd.xlane.f32.xlu1 %v1564_v27 }
 0x1ca   :  { %1653 = vadd.xlane.f32.xlu1 %v1652_v29 }
 0x200   :  { %v1555_v30 = vpop.permute.xlu1 %1554  ;;  %v1638_v31 = vpop.permute.xlu0 %1637 }
 0x201   :  { %v1557_v32 = vsel %vm1468_vm3, %v1555_v30, 0.0  ;;  %v1640_v38 = vsel %vm1468_vm3, %v1638_v31, 0.0  ;;  %v1001_v30 = vld [vmem:[%s3277_s2] sm:$0xff] }
 0x202   :  { %1558 = vadd.xlane.f32.xlu0 %v1557_v32  ;;  %v1006_v31 = vsel %vm1004_vm8, %v1001_v30, 0 }
 0x203   :  { %v1075_v32 = vand.u32 4294901760, %v1006_v31 }
 0x204   :  { %v1569_v33 = vpop.permute.xlu1 %1568  ;;  %v1576_v34 = vpop.permute.xlu0 %1575 }
 0x205   :  { %v1571_v35 = vsel %vm1468_vm3, %v1569_v33, 0.0  ;;  %v1578_v42 = vsel %vm1468_vm3, %v1576_v34, 0.0  ;;  %v1002_v33 = vld [vmem:[%s3280_s5] sm:$0xff]  ;;  %v1003_v34 = vld [vmem:[%s3280_s5 + $0x8] sm:$0xff] }
 0x206   :  { %1572 = vadd.xlane.f32.xlu0 %v1571_v35  ;;  %v1076_v35 = vsub.f32 %v1006_v31, %v1075_v32 }
 0x208   :  { %v1644_v36 = vpop.permute.xlu1 %1643  ;;  %v1718_v39 = vpop.permute.xlu0 %1717 }
 0x209   :  { %v1646_v37 = vsel %vm1468_vm3, %v1644_v36, 0.0  ;;  %v1720_v46 = vsel %vm1468_vm3, %v1718_v39, 0.0  ;;  %v1009_v36 = vand.u32 4294901760, %v1002_v33 }
 0x20a   :  { %1647 = vadd.xlane.f32.xlu1 %v1646_v37  ;;  %1641 = vadd.xlane.f32.xlu0 %v1640_v38  ;;  %v1012_v37 = vand.u32 4294901760, %v1003_v34  ;;  %v1077_v38 = vand.u32 4294901760, %v1076_v35 }
 0x20c   :  { %v1724_v40 = vpop.permute.xlu1 %1723  ;;  %v1656_v43 = vpop.permute.xlu0 %1655  ;;  %v2699_v39 = vpack.c.bf16 %v1012_v37, %v1009_v36 }
 0x20d   :  { %v1726_v41 = vsel %vm1468_vm3, %v1724_v40, 0.0  ;;  %v1658_v47 = vsel %vm1468_vm3, %v1656_v43, 0.0  ;;  %v1087_v40 = vsub.f32 %v1002_v33, %v1009_v36 }
 0x20e   :  { %1727 = vadd.xlane.f32.xlu1 %v1726_v41  ;;  %1579 = vadd.xlane.f32.xlu0 %v1578_v42  ;;  %v1094_v41 = vsub.f32 %v1003_v34, %v1012_v37  ;;  %v1078_v42 = vsub.f32 %v1076_v35, %v1077_v38 }
 0x20f   :  { %2700 = vmatpush3.bf16.msra.mxu1 %v2699_v39  ;;  %v1088_v43 = vand.u32 4294901760, %v1087_v40 }
 0x210   :  { %v1730_v44 = vpop.permute.xlu1 %1729  ;;  %v1736_v49 = vpop.permute.xlu0 %1735  ;;  %2701 = vmatprep.subr.bf16.mxu1 %v2858_v3 }
 0x211   :  { %v1732_v45 = vsel %vm1468_vm3, %v1730_v44, 0.0  ;;  %v1738_v50 = vsel %vm1468_vm3, %v1736_v49, 0.0  ;;  %v1095_v44 = vand.u32 4294901760, %v1094_v41 }
 0x212   :  { %1733 = vadd.xlane.f32.xlu1 %v1732_v45  ;;  %1721 = vadd.xlane.f32.xlu0 %v1720_v46  ;;  %v1079_v45 = vand.u32 4294901760, %v1078_v42  ;;  %v1089_v46 = vsub.f32 %v1087_v40, %v1088_v43 }
 0x214   :  { %v1488_v52 = vpop.permute.xlu1 %1487  ;;  %2541 = vmatmul.mubr.f32.vlgmr.msra.gmra.mrb[4].mxu1 %v1079_v45 }
 0x215   :  { %v1490_v53 = vmul.f32 %v3070_v11, %v1488_v52  ;;  %2547 = vmatprep.mubr.msk.f32.mxu1 %vm2859_vm1, %v2860_v10  ;;  %v2711_v52 = vpack.c.bf16 %v1095_v44, %v1088_v43 }
 0x216   :  { %1659 = vadd.xlane.f32.xlu0 %v1658_v47  ;;  %1470 = vadd.xlane.f32.xlu1 %v1469_v48  ;;  %v1096_v47 = vsub.f32 %v1094_v41, %v1095_v44  ;;  %v1090_v48 = vand.u32 4294901760, %v1089_v46 }
 0x217   :  { %v1491_v55 = vsel %vm1468_vm3, %v1490_v53, 0.0 }
 0x218   :  { %v1097_v49 = vand.u32 4294901760, %v1096_v47 }
 0x21a   :  { %1739 = vadd.xlane.f32.xlu0 %v1738_v50  ;;  %1485 = vadd.xlane.f32.xlu1 %v1484_v51  ;;  %v2702_v50 = vpack.c.bf16 %v1097_v49, %v1090_v48  ;;  %v2705_v51 = vpack.c.bf16 %v1094_v41, %v1087_v40 }
 0x21c   :  { %2703 = vmatpush3.bf16.msra.mxu1 %v2702_v50 }
 0x21d   :  { %2704 = vmatprep.subr.bf16.mxu1 %v2858_v3 }
 0x21e   :  { %1478 = vadd.xlane.f32.xlu0 %v1477_v54 }
 0x21f   :  { %2548 = vmatmul.mubr.f32.vlgmr.msra.gmra.mrb[4].mxu1 %v1075_v32 }
 0x220   :  { %2706 = vmatpush3.bf16.msra.mxu1 %v2705_v51  ;;  %2554 = vmatprep.mubr.msk.f32.mxu1 %vm2859_vm1, %v2860_v10 }
 0x221   :  { %2707 = vmatprep.subr.bf16.mxu1 %v2858_v3 }
 0x222   :  { %1492 = vadd.xlane.f32.xlu0 %v1491_v55 }
 0x227   :  { %2555 = vmatmul.mubr.f32.vlgmr.msra.gmra.mrb[4].mxu1 %v1076_v35 }
 0x228   :  { %2709 = vmatpush3.bf16.msra.mxu1 %v2699_v39  ;;  %2561 = vmatprep.mubr.msk.f32.mxu1 %vm2859_vm1, %v2860_v10 }
 0x229   :  { %2710 = vmatprep.subr.bf16.mxu1 %v2858_v3 }
 0x22f   :  { %2562 = vmatmul.mubr.f32.vlgmr.msra.gmra.mrb[4].mxu1 %v1077_v38 }
 0x230   :  { %2712 = vmatpush3.bf16.msra.mxu1 %v2711_v52  ;;  %2568 = vmatprep.mubr.msk.f32.mxu1 %vm2859_vm1, %v2860_v10 }
 0x231   :  { %2713 = vmatprep.subr.bf16.mxu1 %v2858_v3 }
 0x237   :  { %2569 = vmatmul.mubr.f32.vlgmr.msra.gmra.mrb[4].mxu1 %v1075_v32 }
 0x238   :  { %2715 = vmatpush3.bf16.msra.mxu1 %v2699_v39  ;;  %2575 = vmatprep.mubr.msk.f32.mxu1 %vm2859_vm1, %v2860_v10 }
 0x23f   :  { %2576 = vmatmul.mubr.f32.vlgmr.msra.gmra.mrb[4].mxu1 %v1075_v32 }
 0x253   :  { %v1566_v56 = vpop.xlane.xlu1 %1565 }
 0x257   :  { %v1654_v58 = vpop.xlane.xlu1 %1653 }
 0x28f   :  { %v1559_v57 = vpop.xlane.xlu0 %1558 }
 0x290   :  { %v1581_v62 = vsel %vm1494_vm4, %v1559_v57, %v1566_v56 }
 0x293   :  { %v1573_v59 = vpop.xlane.xlu0 %1572 }
 0x294   :  { %v1582_v63 = vsel %vm1496_vm5, %v1581_v62, %v1573_v59 }
 0x297   :  { %v1648_v60 = vpop.xlane.xlu1 %1647  ;;  %v1642_v61 = vpop.xlane.xlu0 %1641 }
 0x298   :  { %v1661_v7 = vsel %vm1494_vm4, %v1642_v61, %v1648_v60 }
 0x299   :  { %v1662_v9 = vsel %vm1496_vm5, %v1661_v7, %v1654_v58 }
 0x29b   :  { %v1580_v0 = vpop.xlane.xlu0 %1579  ;;  %v1728_v1 = vpop.xlane.xlu1 %1727 }
 0x29c   :  { %v1583_v2 = vsel %vm1498_vm6, %v1582_v63, %v1580_v0 }
 0x29d   :  { %v3116_v4 = vmul.f32 0.35355338, %v1583_v2 }
 0x29f   :  { %v1722_v5 = vpop.xlane.xlu0 %1721  ;;  %v1585_v6 = vsel %vm1501_vm7, %v3116_v4, -inf  ;;  %v1734_v8 = vpop.xlane.xlu1 %1733 }
 0x2a0   :  { %1586 = vmax.xlane.f32.xlu1 %v1585_v6  ;;  %v1741_v12 = vsel %vm1494_vm4, %v1722_v5, %v1728_v1 }
 0x2a1   :  { %v1742_v15 = vsel %vm1496_vm5, %v1741_v12, %v1734_v8  ;;  %v2868_v12 = vmov 0  }
 0x2a2   :  { %2805 = vset.pattern.permute.xlu1 %v2868_v12 }
 0x2a3   :  { %v1660_v11 = vpop.xlane.xlu0 %1659  ;;  %v1471_v18 = vpop.xlane.xlu1 %1470 }
 0x2a4   :  { %v1663_v13 = vsel %vm1498_vm6, %v1662_v9, %v1660_v11  ;;  %v2867_v11 = vmov 1  }
 0x2a5   :  { %v3124_v14 = vmul.f32 0.35355338, %v1663_v13  ;;  %2806 = vset.pattern.permute.xlu0 %v2867_v11 }
 0x2a7   :  { %v1740_v16 = vpop.xlane.xlu0 %1739  ;;  %v1665_v17 = vsel %vm1501_vm7, %v3124_v14, -inf  ;;  %v1486_v24 = vpop.xlane.xlu1 %1485 }
 0x2a8   :  { %v1743_v19 = vsel %vm1498_vm6, %v1742_v15, %v1740_v16  ;;  %1666 = vmax.xlane.f32.xlu0 %v1665_v17 }
 0x2a9   :  { %v3130_v20 = vmul.f32 0.35355338, %v1743_v19 }
 0x2ab   :  { %v1479_v21 = vpop.xlane.xlu0 %1478  ;;  %v1745_v22 = vsel %vm1501_vm7, %v3130_v20, -inf }
 0x2ac   :  { %v1495_v23 = vsel %vm1494_vm4, %v1471_v18, %v1479_v21  ;;  %1746 = vmax.xlane.f32.xlu1 %v1745_v22 }
 0x2ad   :  { %v1497_v26 = vsel %vm1496_vm5, %v1495_v23, %v1486_v24 }
 0x2af   :  { %v1493_v25 = vpop.xlane.xlu0 %1492 }
 0x2b0   :  { %v1499_v27 = vsel %vm1498_vm6, %v1497_v26, %v1493_v25  ;;  %v2869_v25 = vmov 2  }
 0x2b1   :  { %v3137_v28 = vmul.f32 0.35355338, %v1499_v27 }
 0x2b3   :  { %v1502_v29 = vsel %vm1501_vm7, %v3137_v28, -inf }
 0x2b4   :  { %1503 = vmax.xlane.f32.xlu0 %v1502_v29 }
 0x32d   :  { %v1587_v53 = vpop.xlane.xlu1 %1586 }
 0x32e   :  { %v1588_v54 = vsub.f32 %v3116_v4, %v1587_v53 }
 0x330   :  { %v1589_v55 = vmul.f32 1.442695, %v1588_v54 }
 0x332   :  { %2818 = vpow2.f32 %v1589_v55 }
 0x335   :  { %v1667_v56 = vpop.xlane.xlu0 %1666 }
 0x336   :  { %v1668_v57 = vsub.f32 %v3124_v14, %v1667_v56  ;;  %v3174_v14 = vpop.f32.mrb[4].mxu1 }
 0x337   :  { %v2577_v16 = vpop.f32.mrb[5].mxu1 }
 0x338   :  { %v1669_v58 = vmul.f32 1.442695, %v1668_v57 }
 0x339   :  { %v1747_v59 = vpop.xlane.xlu1 %1746 }
 0x33a   :  { %2820 = vpow2.f32 %v1669_v58  ;;  %v1748_v60 = vsub.f32 %v3130_v20, %v1747_v59 }
 0x33c   :  { %v2819_v61 = vpop.eup %2818  ;;  %v1749_v62 = vmul.f32 1.442695, %v1748_v60 }
 0x33d   :  { %v1591_v63 = vsel %vm1501_vm7, %v2819_v61, 0.0 }
 0x33e   :  { %2822 = vpow2.f32 %v1749_v62  ;;  %1592 = vadd.xlane.f32.xlu1 %v1591_v63 }
 0x341   :  { %v1504_v0 = vpop.xlane.xlu0 %1503 }
 0x342   :  { %v1505_v1 = vsub.f32 %v3137_v28, %v1504_v0  ;;  %v2870_v28 = vmov 3  }
 0x344   :  { %v2821_v2 = vpop.eup %2820  ;;  %v1506_v4 = vmul.f32 1.442695, %v1505_v1 }
 0x345   :  { %v1671_v5 = vsel %vm1501_vm7, %v2821_v2, 0.0 }
 0x346   :  { %2824 = vpow2.f32 %v1506_v4  ;;  %1672 = vadd.xlane.f32.xlu0 %v1671_v5 }
 0x348   :  { %v2823_v6 = vpop.eup %2822 }
 0x349   :  { %v1751_v7 = vsel %vm1501_vm7, %v2823_v6, 0.0 }
 0x34a   :  { %1752 = vadd.xlane.f32.xlu1 %v1751_v7 }
 0x350   :  { %v2825_v8 = vpop.eup %2824 }
 0x351   :  { %v1508_v9 = vsel %vm1501_vm7, %v2825_v8, 0.0 }
 0x352   :  { %1509 = vadd.xlane.f32.xlu0 %v1508_v9  ;;  %v1807_v9 = vld [vmem:[%s3281_s6] sm:$0xff] }
 0x3cb   :  { %v1593_v13 = vpop.xlane.xlu1 %1592 }
 0x3cc   :  { %2826 = vrcp.f32 %v1593_v13  ;;  %v1815_v13 = vand.u32 4294901760, %v1807_v9 }
 0x3d3   :  { %v1673_v18 = vpop.xlane.xlu0 %1672 }
 0x3d6   :  { %v2827_v15 = vpop.eup %2826 }
 0x3d7   :  { %v1595_v17 = vmul.f32 %v2827_v15, %v2819_v61  ;;  %v1753_v21 = vpop.xlane.xlu1 %1752 }
 0x3d9   :  { %1603 = vperm.xlu0 %2806, %v1595_v17  }
 0x3df   :  { %v1510_v19 = vpop.xlane.xlu0 %1509 }
 0x3e0   :  { %2828 = vrcp.f32 %v1510_v19 }
 0x3e1   :  { %2830 = vrcp.f32 %v1673_v18  ;;  %v3214_v18 = vsub.f32 %v1807_v9, %v1815_v13 }
 0x3e2   :  { %2832 = vrcp.f32 %v1753_v21 }
 0x3ea   :  { %v2829_v20 = vpop.eup %2828 }
 0x3eb   :  { %v1512_v22 = vmul.f32 %v2829_v20, %v2825_v8  ;;  %v2831_v23 = vpop.eup %2830 }
 0x3ec   :  { %v1675_v24 = vmul.f32 %v2831_v23, %v2821_v2  ;;  %v2833_v26 = vpop.eup %2832  ;;  %v1810_v23 = vld [vmem:[%s3281_s6 + $0x18] sm:$0xff] }
 0x3ed   :  { %1515 = vperm.xlu1 %2805, %v1512_v22   ;;  %1520 = vperm.xlu0 %2806, %v1512_v22   ;;  %v1755_v27 = vmul.f32 %v2833_v26, %v2823_v6  ;;  %v1896_v26 = vand.u32 4294901760, %v3214_v18 }
 0x3f1   :  { %2807 = vset.pattern.permute.xlu1 %v2867_v11  ;;  %2814 = vset.pattern.permute.xlu0 %v2869_v25 }
 0x3f2   :  { %1683 = vperm.xlu1 %2807, %v1675_v24   ;;  %1530 = vperm.xlu0 %2814, %v1512_v22  }
 0x3f6   :  { %2808 = vset.pattern.permute.xlu1 %v2869_v25  ;;  %2815 = vset.pattern.permute.xlu0 %v2868_v12 }
 0x3f7   :  { %1613 = vperm.xlu1 %2808, %v1595_v17   ;;  %1598 = vperm.xlu0 %2815, %v1595_v17  }
 0x3fb   :  { %2809 = vset.pattern.permute.xlu1 %v2867_v11  ;;  %2817 = vset.pattern.permute.xlu0 %v2870_v28  ;;  %v1808_v11 = vld [vmem:[%s3281_s6 + $0x8] sm:$0xff] }
 0x3fc   :  { %1763 = vperm.xlu1 %2809, %v1755_v27   ;;  %v1818_v15 = vand.u32 4294901760, %v1808_v11 }
 0x3fe   :  { %v1902_v19 = vsub.f32 %v1808_v11, %v1818_v15 }
 0x400   :  { %2810 = vset.pattern.permute.xlu1 %v2869_v25 }
 0x401   :  { %1693 = vperm.xlu1 %2810, %v1675_v24  }
 0x405   :  { %2811 = vset.pattern.permute.xlu1 %v2870_v28 }
 0x406   :  { %1623 = vperm.xlu1 %2811, %v1595_v17   ;;  %v3212_v17 = vpack.c.bf16 %v1818_v15, %v1815_v13 }
 0x408   :  { %2718 = vmatpush3.bf16.msra.mxu0 %v3212_v17 }
 0x409   :  { %2719 = vmatprep.subr.bf16.mxu0 %v2858_v3 }
 0x40a   :  { %2812 = vset.pattern.permute.xlu1 %v2869_v25  ;;  %v1824_v25 = vand.u32 4294901760, %v1810_v23 }
 0x40b   :  { %1773 = vperm.xlu1 %2812, %v1755_v27  }
 0x40f   :  { %2813 = vset.pattern.permute.xlu1 %v2870_v28 }
 0x410   :  { %1703 = vperm.xlu1 %2813, %v1675_v24  }
 0x414   :  { %1783 = vperm.xlu1 %2813, %v1755_v27  }
 0x418   :  { %1540 = vperm.xlu1 %2813, %v1512_v22   ;;  %v1809_v22 = vld [vmem:[%s3281_s6 + $0x10] sm:$0xff]  ;;  %s2871_s6 = smov [#allocation2]  }
 0x419   :  { %s2306_s10 = sshll.u32 %s2871_s6, 4  ;;  %s2307_s10 = int_to_ptr.vmem [resolvable:$true] %s2306_s10 }
 0x41a   :  { %s2834_s11 = scalar_lea.vmem %s2307_s10, 128  ;;  %p2839_p1 = scmp.lt.s32.totalorder %s2307_s10, %s2307_s10 }
 0x41b   :  { %p2835_p0 = scmp.ne.s32.totalorder %s2307_s10, %s2834_s11  ;;  %p2840_p2 = scmp.lt.s32.totalorder %s2834_s11, %s2834_s11 }
 0x41c   :  { %2816 = vset.pattern.permute.xlu1 %v2868_v12 }
 0x41d   :  { %1678 = vperm.xlu1 %2816, %v1675_v24   ;;  %v1821_v24 = vand.u32 4294901760, %v1809_v22  ;;  %p2841_p3 = por %p2840_p2, %p2839_p1 }
 0x41f   :  { %p2842_p4 = pnand %p2841_p3, %p2835_p0 }
 0x421   :  { %1758 = vperm.xlu1 %2816, %v1755_v27   ;;  %v1903_v27 = vand.u32 4294901760, %v1902_v19 }
 0x458   :  { %v1604_v29 = vpop.permute.xlu0 %1603 }
 0x459   :  { %v1606_v30 = vmul.f32 %v1604_v29, %v3174_v14 }
 0x45b   :  { %1608 = vrot.lane.b32.xlu0 %v1606_v30, %s2864_s18 }
 0x46c   :  { %v1521_v31 = vpop.permute.xlu0 %1520  ;;  %v1516_v32 = vpop.permute.xlu1 %1515 }
 0x46d   :  { %v1523_v33 = vmul.f32 %v1521_v31, %v3174_v14  ;;  %v1518_v34 = vmul.f32 %v1516_v32, %v3174_v14  ;;  %v3226_v31 = vpack.c.bf16 %v1824_v25, %v1821_v24  ;;  %v1909_v32 = vsub.f32 %v1809_v22, %v1821_v24 }
 0x46f   :  { %1525 = vrot.lane.b32.xlu1 %v1523_v33, %s2864_s18  ;;  %v1916_v33 = vsub.f32 %v1810_v23, %v1824_v25  ;;  %2721 = vmatpush3.bf16.msra.mxu0 %v3226_v31 }
 0x470   :  { %2722 = vmatprep.subr.bf16.mxu0 %v2858_v3 }
 0x471   :  { %v1531_v35 = vpop.permute.xlu0 %1530  ;;  %v1684_v36 = vpop.permute.xlu1 %1683 }
 0x472   :  { %v1533_v37 = vmul.f32 %v1531_v35, %v3174_v14  ;;  %v1686_v38 = vmul.f32 %v1684_v36, %v3174_v14  ;;  %v1904_v35 = vsub.f32 %v1902_v19, %v1903_v27 }
 0x474   :  { %1535 = vrot.lane.b32.xlu1 %v1533_v37, %s2863_s17  ;;  %v1910_v37 = vand.u32 4294901760, %v1909_v32 }
 0x476   :  { %v1614_v39 = vpop.permute.xlu1 %1613  ;;  %v1599_v61 = vpop.permute.xlu0 %1598 }
 0x477   :  { %v1616_v40 = vmul.f32 %v1614_v39, %v3174_v14  ;;  %v1601_v0 = vmul.f32 %v1599_v61, %v3174_v14 }
 0x478   :  { %1688 = vrot.lane.b32.xlu1 %v1686_v38, %s2864_s18  ;;  %v1917_v38 = vand.u32 4294901760, %v1916_v33 }
 0x479   :  { %1618 = vrot.lane.b32.xlu0 %v1616_v40, %s2863_s17 }
 0x47b   :  { %v1764_v41 = vpop.permute.xlu1 %1763 }
 0x47c   :  { %v1766_v42 = vmul.f32 %v1764_v41, %v3174_v14  ;;  %v1905_v41 = vand.u32 4294901760, %v1904_v35 }
 0x47e   :  { %1768 = vrot.lane.b32.xlu1 %v1766_v42, %s2864_s18 }
 0x480   :  { %v1694_v43 = vpop.permute.xlu1 %1693 }
 0x481   :  { %v1696_v44 = vmul.f32 %v1694_v43, %v3174_v14  ;;  %v1911_v43 = vsub.f32 %v1909_v32, %v1910_v37 }
 0x483   :  { %1698 = vrot.lane.b32.xlu0 %v1696_v44, %s2863_s17  ;;  %v1918_v44 = vsub.f32 %v1916_v33, %v1917_v38 }
 0x485   :  { %v1624_v45 = vpop.permute.xlu1 %1623 }
 0x486   :  { %v1626_v46 = vmul.f32 %v1624_v45, %v3174_v14 }
 0x488   :  { %1628 = vrot.lane.b32.xlu1 %v1626_v46, %s2866_s20  ;;  %v1912_v46 = vand.u32 4294901760, %v1911_v43 }
 0x48a   :  { %v1774_v47 = vpop.permute.xlu1 %1773 }
 0x48b   :  { %v1776_v48 = vmul.f32 %v1774_v47, %v3174_v14  ;;  %v1919_v47 = vand.u32 4294901760, %v1918_v44 }
 0x48d   :  { %1778 = vrot.lane.b32.xlu0 %v1776_v48, %s2863_s17  ;;  %v2726_v48 = vpack.c.bf16 %v1919_v47, %v1912_v46 }
 0x48f   :  { %v1704_v49 = vpop.permute.xlu1 %1703 }
 0x490   :  { %v1706_v50 = vmul.f32 %v1704_v49, %v3174_v14  ;;  %v2729_v49 = vpack.c.bf16 %v1902_v19, %v3214_v18 }
 0x492   :  { %1708 = vrot.lane.b32.xlu1 %v1706_v50, %s2866_s20  ;;  %v2732_v50 = vpack.c.bf16 %v1916_v33, %v1909_v32 }
 0x493   :  { %v1784_v51 = vpop.permute.xlu1 %1783 }
 0x494   :  { %v1786_v52 = vmul.f32 %v1784_v51, %v3174_v14  ;;  %v2741_v51 = vpack.c.bf16 %v1903_v27, %v1896_v26 }
 0x496   :  { %1788 = vrot.lane.b32.xlu0 %v1786_v52, %s2866_s20  ;;  %v2744_v52 = vpack.c.bf16 %v1917_v38, %v1910_v37 }
 0x497   :  { %v1541_v53 = vpop.permute.xlu1 %1540 }
 0x498   :  { %v1543_v54 = vmul.f32 %v1541_v53, %v3174_v14 }
 0x49a   :  { %1545 = vrot.lane.b32.xlu1 %v1543_v54, %s2866_s20 }
 0x49c   :  { %v1679_v55 = vpop.permute.xlu1 %1678 }
 0x49d   :  { %v1681_v8 = vmul.f32 %v1679_v55, %v3174_v14 }
 0x4a0   :  { %v1759_v56 = vpop.permute.xlu1 %1758 }
 0x4a1   :  { %v1761_v20 = vmul.f32 %v1759_v56, %v3174_v14 }
 0x4cd   :  { %v1609_v62 = vpop.permute.xlu0 %1608 }
 0x4ce   :  { %v1611_v4 = vadd.f32 %v1609_v62, %v1601_v0 }
 0x4e1   :  { %v1526_v57 = vpop.permute.xlu1 %1525 }
 0x4e2   :  { %v1528_v58 = vadd.f32 %v1526_v57, %v1518_v34  ;;  %v1897_v34 = vsub.f32 %v3214_v18, %v1896_v26 }
 0x4e4   :  { %v1898_v40 = vand.u32 4294901760, %v1897_v34 }
 0x4e6   :  { %v1536_v59 = vpop.permute.xlu1 %1535  ;;  %v2723_v45 = vpack.c.bf16 %v1905_v41, %v1898_v40 }
 0x4e7   :  { %v3201_v60 = vadd.f32 %v1536_v59, %v1528_v58 }
 0x4ea   :  { %v1689_v63 = vpop.permute.xlu1 %1688 }
 0x4eb   :  { %v1619_v1 = vpop.permute.xlu0 %1618  ;;  %v1691_v16 = vadd.f32 %v1689_v63, %v1681_v8 }
 0x4ec   :  { %v1621_v5 = vadd.f32 %v1619_v1, %v1611_v4 }
 0x4f0   :  { %v1769_v2 = vpop.permute.xlu1 %1768 }
 0x4f1   :  { %v1771_v28 = vadd.f32 %v1769_v2, %v1761_v20 }
 0x4f5   :  { %v1699_v12 = vpop.permute.xlu0 %1698 }
 0x4f6   :  { %v1701_v21 = vadd.f32 %v1699_v12, %v1691_v16 }
 0x4fa   :  { %v1629_v6 = vpop.permute.xlu1 %1628 }
 0x4fb   :  { %v1631_v7 = vadd.f32 %v1629_v6, %v1621_v5 }
 0x4fd   :  { %1793 = vrot.lane.b32.xlu0 %v1631_v7, %s2862_s4 }
 0x4ff   :  { %v1779_v29 = vpop.permute.xlu0 %1778 }
 0x500   :  { %v1781_v36 = vadd.f32 %v1779_v29, %v1771_v28 }
 0x504   :  { %v1709_v30 = vpop.permute.xlu1 %1708 }
 0x505   :  { %v1711_v14 = vadd.f32 %v1709_v30, %v1701_v21 }
 0x507   :  { %1797 = vrot.lane.b32.xlu1 %v1711_v14, %s2861_s1 }
 0x508   :  { %v1789_v39 = vpop.permute.xlu0 %1788 }
 0x509   :  { %v1791_v42 = vadd.f32 %v1789_v39, %v1781_v36 }
 0x50b   :  { %1801 = vrot.lane.b32.xlu0 %v1791_v42, %s2865_s19 }
 0x50c   :  { %v1546_v53 = vpop.permute.xlu1 %1545 }
 0x50d   :  { %v1548_v55 = vadd.f32 %v1546_v53, %v3201_v60 }
 0x56f   :  { %v1794_v54 = vpop.permute.xlu0 %1793 }
 0x570   :  { %v1804_v57 = vsel %vm1468_vm3, %v1548_v55, %v1794_v54 }
 0x579   :  { %v1798_v56 = vpop.permute.xlu1 %1797 }
 0x57a   :  { %v1805_v58 = vsel %vm1004_vm8, %v1804_v57, %v1798_v56 }
 0x57d   :  { %v1802_v59 = vpop.permute.xlu0 %1801 }
 0x57e   :  { %v1806_v61 = vsel %vm525_vm2, %v1805_v58, %v1802_v59 }
 0x57f   :  { %v1812_v62 = vsel %vm32_vm0, %v1806_v61, 0 }
 0x580   :  { %v1883_v63 = vand.u32 4294901760, %v1812_v62 }
 0x582   :  { %v1884_v0 = vsub.f32 %v1812_v62, %v1883_v63 }
 0x584   :  { %v1885_v1 = vand.u32 4294901760, %v1884_v0 }
 0x586   :  { %v1886_v2 = vsub.f32 %v1884_v0, %v1885_v1 }
 0x588   :  { %v1887_v4 = vand.u32 4294901760, %v1886_v2 }
 0x58a   :  { %2587 = vmatmul.mubr.f32.vlgmr.msra.gmra.mrb[2].mxu0 %v1887_v4 }
 0x58b   :  { %2724 = vmatpush3.bf16.msra.mxu0 %v2723_v45  ;;  %2597 = vmatprep.mubr.msk.f32.mxu0 %vm2859_vm1, %v2860_v10 }
 0x58c   :  { %2725 = vmatprep.subr.bf16.mxu0 %v2858_v3 }
 0x58f   :  { %2727 = vmatpush3.bf16.msra.mxu0 %v2726_v48 }
 0x590   :  { %2728 = vmatprep.subr.bf16.mxu0 %v2858_v3 }
 0x592   :  { %2598 = vmatmul.mubr.f32.vlgmr.msra.gmra.mrb[2].mxu0 %v1883_v63 }
 0x593   :  { %2730 = vmatpush3.bf16.msra.mxu0 %v2729_v49  ;;  %2608 = vmatprep.mubr.msk.f32.mxu0 %vm2859_vm1, %v2860_v10 }
 0x594   :  { %2731 = vmatprep.subr.bf16.mxu0 %v2858_v3 }
 0x597   :  { %2733 = vmatpush3.bf16.msra.mxu0 %v2732_v50 }
 0x598   :  { %2734 = vmatprep.subr.bf16.mxu0 %v2858_v3 }
 0x59a   :  { %2609 = vmatmul.mubr.f32.vlgmr.msra.gmra.mrb[2].mxu0 %v1884_v0 }
 0x59b   :  { %2736 = vmatpush3.bf16.msra.mxu0 %v3212_v17  ;;  %2619 = vmatprep.mubr.msk.f32.mxu0 %vm2859_vm1, %v2860_v10 }
 0x59c   :  { %2737 = vmatprep.subr.bf16.mxu0 %v2858_v3 }
 0x59f   :  { %2739 = vmatpush3.bf16.msra.mxu0 %v3226_v31 }
 0x5a0   :  { %2740 = vmatprep.subr.bf16.mxu0 %v2858_v3 }
 0x5a2   :  { %2620 = vmatmul.mubr.f32.vlgmr.msra.gmra.mrb[2].mxu0 %v1885_v1 }
 0x5a3   :  { %2742 = vmatpush3.bf16.msra.mxu0 %v2741_v51  ;;  %2630 = vmatprep.mubr.msk.f32.mxu0 %vm2859_vm1, %v2860_v10 }
 0x5a4   :  { %2743 = vmatprep.subr.bf16.mxu0 %v2858_v3 }
 0x5a7   :  { %2745 = vmatpush3.bf16.msra.mxu0 %v2744_v52 }
 0x5a8   :  { %2746 = vmatprep.subr.bf16.mxu0 %v2858_v3 }
 0x5aa   :  { %2631 = vmatmul.mubr.f32.vlgmr.msra.gmra.mrb[2].mxu0 %v1883_v63 }
 0x5ab   :  { %2748 = vmatpush3.bf16.msra.mxu0 %v3212_v17  ;;  %2641 = vmatprep.mubr.msk.f32.mxu0 %vm2859_vm1, %v2860_v10 }
 0x5ac   :  { %2749 = vmatprep.subr.bf16.mxu0 %v2858_v3 }
 0x5af   :  { %2751 = vmatpush3.bf16.msra.mxu0 %v3226_v31 }
 0x5b2   :  { %2642 = vmatmul.mubr.f32.vlgmr.msra.gmra.mrb[2].mxu0 %v1883_v63 }
 0x685   :  { %v2295_v60 = vpop.f32.mrb[2].mxu0 }
 0x686   :  { %2299 = vst.msk [vmem:[#allocation2] sm:$0xff] %vm32_vm0, %v2295_v60  ;;  %v2643_v5 = vpop.f32.mrb[3].mxu0 }
 0x687   :  { %2845 = shalt.err (!%p2842_p4)
}
 0x688   :  { %s2846_s3 = scalar_lea.hbm %s3282_s7, 128 }
 0x689   :  { %p2847_p5 = scmp.ne.s32.totalorder %s3282_s7, %s2846_s3  ;;  %p2850_p6 = scmp.lt.u32.totalorder %s2846_s3, %s3282_s7 }
 0x68b   :  { %p2852_p7 = pnand %p2850_p6, %p2847_p5 }
 0x68d   :  { %2855 = shalt.err (!%p2852_p7)
}
 0x68e   :  { %2309 = dma.vmem_to_hbm [thread:$0]  %s2307_s10, 128, %s3282_s7, [#allocation3]  }
 0x68f   :  { %2856 = dma.done.wait [#allocation3], 128  }
 0x690   :  { %2857 = vsyncadd [#allocation3], 4294967168 }
 0x691   :  { %2313 = vsyncpa [#allocation3], 1 }

</bundles_post_ra>
